<compile_context>
chip_gen: v5e
topology: v5e:2x2
jax: 0.10.0
libtpu: 0.0.40
codegen_flags: <defaults>
</compile_context>

<pallas_src>
import jax
import jax.numpy as jnp
from jax import lax
from jax.experimental import pallas as pl
from jax.experimental.pallas import tpu as pltpu

# ---- module-level constants (from the reference code's globals) -------------
TRAN_LABEL_NUM = 1      # num_labels; must be 1 for .squeeze(-1) to drop the axis
SPLIT_MLP_SIZE = 32     # hidden_size of the bi-affine MLPs
OPT_ATTN = False        # False -> include the out_d term (full bi-affine)

NEG_INF = -100000000.0


def split_attention_kernel(e_ref, d_ref, m_ref,
                           we_ref, be_ref, wd_ref, bd_ref, M_ref,
                           o_ref):
    """One grid step = one batch (batch dim squeezed out by the BlockSpecs).

    e_ref : (Le, E)  d_ref : (Ld, D)  m_ref : (Ld, Le) f32
    we_ref: (E, H+1) be_ref: (1, H+1) wd_ref: (D, H+1) bd_ref: (1, H+1)
    M_ref : (H+1, H+1) augmented bi-affine matrix
    o_ref : (Ld, Le) f32
    """
    # Encoder / decoder MLPs (Linear + ReLU) with the augmented constant-1
    # column: last output column = relu(x @ 0 + 1) = 1.
    e_h = jnp.maximum(
        jnp.dot(e_ref[...], we_ref[...], preferred_element_type=jnp.float32)
        + be_ref[...], 0.0)                                   # (Le, H+1)
    d_h = jnp.maximum(
        jnp.dot(d_ref[...], wd_ref[...], preferred_element_type=jnp.float32)
        + bd_ref[...], 0.0)                                   # (Ld, H+1)

    # du = [d_h @ U + W_e, d_h . W_d + b]  via one matmul with M.
    du = jnp.dot(d_h, M_ref[...], preferred_element_type=jnp.float32)  # (Ld, H+1)

    # Bi-affine product: contract the last dims of both operands (NT form,
    # no explicit e_h.T relayout).  The constant-1 column of e_h picks up the
    # (W_d . d_h + b) row term automatically.
    s = lax.dot_general(du, e_h, (((1,), (1,)), ((), ())),
                        preferred_element_type=jnp.float32)   # (Ld, Le)

    o_ref[...] = jnp.where(m_ref[...] == 0.0, NEG_INF, s)


def split_attention(e_outputs, d_outputs, masks, params):
    """e_outputs: (B, Le, E) f32, d_outputs: (B, Ld, D) f32, masks: (B, Ld, Le)."""
    assert TRAN_LABEL_NUM == 1, "squeeze(-1) semantics require num_labels == 1"

    B, Le, E = e_outputs.shape
    _, Ld, D = d_outputs.shape
    H = SPLIT_MLP_SIZE
    H1 = H + 1

    we_mlp, be_mlp, wd_mlp, bd_mlp, W_e, W_d, U, b = params
    f32 = jnp.float32

    # --- parameter folding (parameter-sized, one-time; hoist out of the step
    # --- function / precompute once in production) ------------------------
    # Augmented MLPs: extra zero weight column + bias 1.0 -> constant-1 output
    # column (relu(1) = 1).
    we_aug = jnp.concatenate([we_mlp, jnp.zeros((E, 1), f32)], axis=1)   # (E, H+1)
    be_aug = jnp.concatenate([be_mlp, jnp.ones((1, 1), f32)], axis=1)    # (1, H+1)
    wd_aug = jnp.concatenate([wd_mlp, jnp.zeros((D, 1), f32)], axis=1)   # (D, H+1)
    bd_aug = jnp.concatenate([bd_mlp, jnp.ones((1, 1), f32)], axis=1)    # (1, H+1)
    # Augmented bi-affine matrix M = [[U0, W_d0^T], [W_e0, b]]:
    #   (d_h_aug @ M) @ e_h_aug^T = d_h U e_h^T + W_e.e_h + W_d.d_h + b
    wd_col = jnp.zeros((H, 1), f32) if OPT_ATTN else W_d[0][:, None]
    top = jnp.concatenate([U[0], wd_col], axis=1)                        # (H, H+1)
    bot = jnp.concatenate([W_e[0][None, :], b.reshape(1, 1)], axis=1)    # (1, H+1)
    M = jnp.concatenate([top, bot], axis=0)                              # (H+1, H+1)

    masks = jnp.asarray(masks, f32)   # no padding, no int8 cast

    flops = 2 * B * (Le * E * H1 + Ld * D * H1 + Ld * H1 * H1 + Ld * H1 * Le)
    bytes_accessed = 4 * (B * (Le * E + Ld * D + 2 * Ld * Le)
                          + (E + D + 2 + H1) * H1)

    out = pl.pallas_call(
        split_attention_kernel,
        out_shape=jax.ShapeDtypeStruct((B, Ld, Le), jnp.float32),
        grid=(B,),
        in_specs=[
            # One batch per step; block last-two dims == full array dims so no
            # padding is required.  Batch dim is squeezed (None).
            pl.BlockSpec((None, Le, E), lambda bb: (bb, 0, 0)),   # encoder rows
            pl.BlockSpec((None, Ld, D), lambda bb: (bb, 0, 0)),   # decoder rows
            pl.BlockSpec((None, Ld, Le), lambda bb: (bb, 0, 0)),  # mask (f32)
            # Weights: constant block index -> DMA'd once, reused every step.
            pl.BlockSpec((E, H1), lambda bb: (0, 0)),             # e_mlp W (aug)
            pl.BlockSpec((1, H1), lambda bb: (0, 0)),             # e_mlp b (aug)
            pl.BlockSpec((D, H1), lambda bb: (0, 0)),             # d_mlp W (aug)
            pl.BlockSpec((1, H1), lambda bb: (0, 0)),             # d_mlp b (aug)
            pl.BlockSpec((H1, H1), lambda bb: (0, 0)),            # M (aug bi-affine)
        ],
        out_specs=pl.BlockSpec((None, Ld, Le), lambda bb: (bb, 0, 0)),
        compiler_params=pltpu.CompilerParams(
            dimension_semantics=("parallel",)),   # shard batch axis on v7x TCs
        cost_estimate=pl.CostEstimate(flops=flops, transcendentals=0,
                                      bytes_accessed=bytes_accessed),
    )(e_outputs, d_outputs, masks, we_aug, be_aug, wd_aug, bd_aug, M)

    return out


def reference(e_outputs, d_outputs, masks, params):
    """Pure-JAX mirror of the PyTorch module (ground truth)."""
    we_mlp, be_mlp, wd_mlp, bd_mlp, W_e, W_d, U, b = params
    e_h = jax.nn.relu(e_outputs @ we_mlp + be_mlp[0])            # (B, Le, H)
    d_h = jax.nn.relu(d_outputs @ wd_mlp + bd_mlp[0])            # (B, Ld, H)
    out_e = jnp.einsum('lh,bjh->blj', W_e, e_h)[:, :, None, :]   # (B,L,1,Le)
    out_d = jnp.einsum('lh,bih->bli', W_d, d_h)[:, :, :, None]   # (B,L,Ld,1)
    out_u = jnp.einsum('bih,lhg,bjg->blij', d_h, U, e_h)         # (B,L,Ld,Le)
    if OPT_ATTN:
        out = out_e + out_u + b[0, 0, 0]
    else:
        out = out_e + out_d + out_u + b[0, 0, 0]
    out = jnp.transpose(out, (0, 2, 3, 1))                       # (B,Ld,Le,L)
    attn = out[..., 0]                                           # squeeze(-1)
    return jnp.where(masks == 0, NEG_INF, attn)


def make_params(key, encoder_size, decoder_size):
    H, L = SPLIT_MLP_SIZE, TRAN_LABEL_NUM
    ks = jax.random.split(key, 7)

    def xavier(k, shape, fan_in, fan_out):
        std = (2.0 / (fan_in + fan_out)) ** 0.5
        return std * jax.random.normal(k, shape, dtype=jnp.float32)

    we_mlp = xavier(ks[0], (encoder_size, H), encoder_size, H)   # stored (in, out)
    be_mlp = 0.01 * jax.random.normal(ks[1], (1, H), dtype=jnp.float32)
    wd_mlp = xavier(ks[2], (decoder_size, H), decoder_size, H)
    bd_mlp = 0.01 * jax.random.normal(ks[3], (1, H), dtype=jnp.float32)
    W_e = xavier(ks[4], (L, H), H, L)
    W_d = xavier(ks[5], (L, H), H, L)
    U = xavier(ks[6], (L, H, H), H, H)
    b = jnp.zeros((L, 1, 1), dtype=jnp.float32)                  # (num_labels,1,1)
    return (we_mlp, be_mlp, wd_mlp, bd_mlp, W_e, W_d, U, b)


if __name__ == "__main__":
    # small shapes consistent with the module: split_num = 8
    B = 2
    split_num = 8
    Ld = split_num            # length_decoder
    Le = split_num + 2        # length_encoder
    encoder_size = 32
    decoder_size = 32

    key = jax.random.PRNGKey(0)
    k_e, k_d, k_m, k_p = jax.random.split(key, 4)

    e_outputs = jax.random.normal(k_e, (B, Le, encoder_size), dtype=jnp.float32)
    d_outputs = jax.random.normal(k_d, (B, Ld, decoder_size), dtype=jnp.float32)
    masks = (jax.random.uniform(k_m, (B, Ld, Le)) > 0.3).astype(jnp.float32)

    params = make_params(k_p, encoder_size, decoder_size)

    out = split_attention(e_outputs, d_outputs, masks, params)
    out = jax.block_until_ready(out)

    ref = reference(e_outputs, d_outputs, masks, params)
    assert out.shape == (B, Ld, Le)
    assert jnp.allclose(out, ref, atol=1e-4, rtol=1e-4), "mismatch vs reference"

    print("KERNEL_OK")
</pallas_src>

<mosaic_0001>
module attributes {stable_mosaic.version = 11 : i64} {
  func.func @split_attention_kernel(%arg0: i32, %arg1: memref<1x10x32xf32, #tpu.memory_space<vmem>>, %arg2: memref<1x8x32xf32, #tpu.memory_space<vmem>>, %arg3: memref<1x8x10xf32, #tpu.memory_space<vmem>>, %arg4: memref<32x33xf32, #tpu.memory_space<vmem>>, %arg5: memref<1x33xf32, #tpu.memory_space<vmem>>, %arg6: memref<32x33xf32, #tpu.memory_space<vmem>>, %arg7: memref<1x33xf32, #tpu.memory_space<vmem>>, %arg8: memref<33x33xf32, #tpu.memory_space<vmem>>, %arg9: memref<1x8x10xf32, #tpu.memory_space<vmem>>) attributes {dimension_semantics = [#tpu.dimension_semantics<parallel>], iteration_bounds = array<i64: 2>, scalar_prefetch = 0 : i64, scratch_operands = 0 : i64, tpu.core_type = #tpu.core_type<tc>, window_params = [{transform_indices = @transform_0, window_bounds = array<i64: 1, 10, 32>}, {transform_indices = @transform_1, window_bounds = array<i64: 1, 8, 32>}, {transform_indices = @transform_2, window_bounds = array<i64: 1, 8, 10>}, {pipeline_mode = #tpu.pipeline_mode<synchronous>, transform_indices = @transform_3, window_bounds = array<i64: 32, 33>}, {pipeline_mode = #tpu.pipeline_mode<synchronous>, transform_indices = @transform_4, window_bounds = array<i64: 1, 33>}, {pipeline_mode = #tpu.pipeline_mode<synchronous>, transform_indices = @transform_5, window_bounds = array<i64: 32, 33>}, {pipeline_mode = #tpu.pipeline_mode<synchronous>, transform_indices = @transform_6, window_bounds = array<i64: 1, 33>}, {pipeline_mode = #tpu.pipeline_mode<synchronous>, transform_indices = @transform_7, window_bounds = array<i64: 33, 33>}, {transform_indices = @transform_8, window_bounds = array<i64: 1, 8, 10>}]} {
    %c0 = arith.constant 0 : index
    %c0_0 = arith.constant 0 : index
    %c0_1 = arith.constant 0 : index
    %0 = vector.load %arg1[%c0, %c0_0, %c0_1] : memref<1x10x32xf32, #tpu.memory_space<vmem>>, vector<1x10x32xf32>
    %1 = vector.shape_cast %0 : vector<1x10x32xf32> to vector<10x32xf32>
    %c0_2 = arith.constant 0 : index
    %c0_3 = arith.constant 0 : index
    %2 = vector.load %arg4[%c0_2, %c0_3] : memref<32x33xf32, #tpu.memory_space<vmem>>, vector<32x33xf32>
    %cst = arith.constant dense<0.000000e+00> : vector<10x33xf32>
    %3 = tpu.matmul %1, %2, %cst {dimension_numbers = #tpu.dot_dimension_numbers<[1], [0], [0], [1], [0, 0, 1, 1], [], []>} : vector<10x32xf32>, vector<32x33xf32>, vector<10x33xf32> -> vector<10x33xf32>
    %c0_4 = arith.constant 0 : index
    %c0_5 = arith.constant 0 : index
    %4 = vector.load %arg5[%c0_4, %c0_5] : memref<1x33xf32, #tpu.memory_space<vmem>>, vector<1x33xf32>
    %5 = vector.broadcast %4 : vector<1x33xf32> to vector<10x33xf32>
    %6 = arith.addf %3, %5 : vector<10x33xf32>
    %cst_6 = arith.constant 0.000000e+00 : f32
    %7 = vector.broadcast %cst_6 : f32 to vector<10x33xf32>
    %8 = arith.maximumf %6, %7 : vector<10x33xf32>
    %c0_7 = arith.constant 0 : index
    %c0_8 = arith.constant 0 : index
    %c0_9 = arith.constant 0 : index
    %9 = vector.load %arg2[%c0_7, %c0_8, %c0_9] : memref<1x8x32xf32, #tpu.memory_space<vmem>>, vector<1x8x32xf32>
    %10 = vector.shape_cast %9 : vector<1x8x32xf32> to vector<8x32xf32>
    %c0_10 = arith.constant 0 : index
    %c0_11 = arith.constant 0 : index
    %11 = vector.load %arg6[%c0_10, %c0_11] : memref<32x33xf32, #tpu.memory_space<vmem>>, vector<32x33xf32>
    %cst_12 = arith.constant dense<0.000000e+00> : vector<8x33xf32>
    %12 = tpu.matmul %10, %11, %cst_12 {dimension_numbers = #tpu.dot_dimension_numbers<[1], [0], [0], [1], [0, 0, 1, 1], [], []>} : vector<8x32xf32>, vector<32x33xf32>, vector<8x33xf32> -> vector<8x33xf32>
    %c0_13 = arith.constant 0 : index
    %c0_14 = arith.constant 0 : index
    %13 = vector.load %arg7[%c0_13, %c0_14] : memref<1x33xf32, #tpu.memory_space<vmem>>, vector<1x33xf32>
    %14 = vector.broadcast %13 : vector<1x33xf32> to vector<8x33xf32>
    %15 = arith.addf %12, %14 : vector<8x33xf32>
    %cst_15 = arith.constant 0.000000e+00 : f32
    %16 = vector.broadcast %cst_15 : f32 to vector<8x33xf32>
    %17 = arith.maximumf %15, %16 : vector<8x33xf32>
    %c0_16 = arith.constant 0 : index
    %c0_17 = arith.constant 0 : index
    %18 = vector.load %arg8[%c0_16, %c0_17] : memref<33x33xf32, #tpu.memory_space<vmem>>, vector<33x33xf32>
    %cst_18 = arith.constant dense<0.000000e+00> : vector<8x33xf32>
    %19 = tpu.matmul %17, %18, %cst_18 {dimension_numbers = #tpu.dot_dimension_numbers<[1], [0], [0], [1], [0, 0, 1, 1], [], []>} : vector<8x33xf32>, vector<33x33xf32>, vector<8x33xf32> -> vector<8x33xf32>
    %cst_19 = arith.constant dense<0.000000e+00> : vector<8x10xf32>
    %20 = tpu.matmul %19, %8, %cst_19 {dimension_numbers = #tpu.dot_dimension_numbers<[1], [1], [0], [0], [0, 0, 1, 0], [], []>} : vector<8x33xf32>, vector<10x33xf32>, vector<8x10xf32> -> vector<8x10xf32>
    %c0_20 = arith.constant 0 : index
    %c0_21 = arith.constant 0 : index
    %c0_22 = arith.constant 0 : index
    %21 = vector.load %arg3[%c0_20, %c0_21, %c0_22] : memref<1x8x10xf32, #tpu.memory_space<vmem>>, vector<1x8x10xf32>
    %22 = vector.shape_cast %21 : vector<1x8x10xf32> to vector<8x10xf32>
    %cst_23 = arith.constant 0.000000e+00 : f32
    %23 = vector.broadcast %cst_23 : f32 to vector<8x10xf32>
    %24 = arith.cmpf oeq, %22, %23 : vector<8x10xf32>
    %cst_24 = arith.constant -1.000000e+08 : f32
    %25 = vector.broadcast %cst_24 : f32 to vector<8x10xf32>
    %26 = arith.select %24, %25, %20 : vector<8x10xi1>, vector<8x10xf32>
    %c0_25 = arith.constant 0 : index
    %c0_26 = arith.constant 0 : index
    %c0_27 = arith.constant 0 : index
    %27 = vector.load %arg9[%c0_25, %c0_26, %c0_27] : memref<1x8x10xf32, #tpu.memory_space<vmem>>, vector<1x8x10xf32>
    %28 = vector.shape_cast %27 : vector<1x8x10xf32> to vector<8x10xf32>
    %29 = vector.shape_cast %26 : vector<8x10xf32> to vector<1x8x10xf32>
    tpu.vector_store %arg9[%c0_25, %c0_26, %c0_27], %29 {strides = array<i32>} : memref<1x8x10xf32, #tpu.memory_space<vmem>>, vector<1x8x10xf32>,
    return
  }
  func.func @transform_0(%arg0: i32) -> (i32, i32, i32) {
    %c0_i32 = arith.constant 0 : i32
    %c0_i32_0 = arith.constant 0 : i32
    %c0_i32_1 = arith.constant 0 : i32
    return %arg0, %c0_i32, %c0_i32_0 : i32, i32, i32
  }
  func.func @transform_1(%arg0: i32) -> (i32, i32, i32) {
    %c0_i32 = arith.constant 0 : i32
    %c0_i32_0 = arith.constant 0 : i32
    %c0_i32_1 = arith.constant 0 : i32
    return %arg0, %c0_i32, %c0_i32_0 : i32, i32, i32
  }
  func.func @transform_2(%arg0: i32) -> (i32, i32, i32) {
    %c0_i32 = arith.constant 0 : i32
    %c0_i32_0 = arith.constant 0 : i32
    %c0_i32_1 = arith.constant 0 : i32
    return %arg0, %c0_i32, %c0_i32_0 : i32, i32, i32
  }
  func.func @transform_3(%arg0: i32) -> (i32, i32) {
    %c0_i32 = arith.constant 0 : i32
    %c0_i32_0 = arith.constant 0 : i32
    %c0_i32_1 = arith.constant 0 : i32
    return %c0_i32, %c0_i32_0 : i32, i32
  }
  func.func @transform_4(%arg0: i32) -> (i32, i32) {
    %c0_i32 = arith.constant 0 : i32
    %c0_i32_0 = arith.constant 0 : i32
    %c0_i32_1 = arith.constant 0 : i32
    return %c0_i32, %c0_i32_0 : i32, i32
  }
  func.func @transform_5(%arg0: i32) -> (i32, i32) {
    %c0_i32 = arith.constant 0 : i32
    %c0_i32_0 = arith.constant 0 : i32
    %c0_i32_1 = arith.constant 0 : i32
    return %c0_i32, %c0_i32_0 : i32, i32
  }
  func.func @transform_6(%arg0: i32) -> (i32, i32) {
    %c0_i32 = arith.constant 0 : i32
    %c0_i32_0 = arith.constant 0 : i32
    %c0_i32_1 = arith.constant 0 : i32
    return %c0_i32, %c0_i32_0 : i32, i32
  }
  func.func @transform_7(%arg0: i32) -> (i32, i32) {
    %c0_i32 = arith.constant 0 : i32
    %c0_i32_0 = arith.constant 0 : i32
    %c0_i32_1 = arith.constant 0 : i32
    return %c0_i32, %c0_i32_0 : i32, i32
  }
  func.func @transform_8(%arg0: i32) -> (i32, i32, i32) {
    %c0_i32 = arith.constant 0 : i32
    %c0_i32_0 = arith.constant 0 : i32
    %c0_i32_1 = arith.constant 0 : i32
    return %arg0, %c0_i32, %c0_i32_0 : i32, i32, i32
  }
}

</mosaic_0001>

<bundles_post_ra>
// kernel: tpu_custom_call.1
= control target key start
LH: loop header
LB: loop body
LE: loop exit
PB: predicated region body
PF: predicated region fallthrough
CT: control target
= control target key end

     0   :  { %s1155_s0 = inlined_call_operand.vmem [shape: f32[2,10,32], index: 0, kind: input, shape index: {}]   ;;  %s1156_s1 = inlined_call_operand.vmem [shape: f32[2,8,32], index: 1, kind: input, shape index: {}]   ;;  %s1157_s2 = inlined_call_operand.hbm [shape: f32[2,8,10], index: 2, kind: input, shape index: {}]   ;;  %s1158_s3 = inlined_call_operand.hbm [shape: f32[32,33], index: 3, kind: input, shape index: {}]   ;;  %s1159_s4 = inlined_call_operand.vmem [shape: f32[1,33], index: 4, kind: input, shape index: {}]   ;;  %s1160_s5 = inlined_call_operand.hbm [shape: f32[32,33], index: 5, kind: input, shape index: {}]   ;;  %s1161_s6 = inlined_call_operand.vmem [shape: f32[1,33], index: 6, kind: input, shape index: {}]   ;;  %s1162_s7 = inlined_call_operand.vmem [shape: f32[33,33], index: 7, kind: input, shape index: {}]   ;;  %s1163_s8 = inlined_call_operand.hbm [shape: f32[2,8,10], index: 8, kind: output, shape index: {}]  }
   0x1   :  { %1164 = sst [smem:[#allocation13_spill]] %s1158_s3 }
   0x2   :  { %1165 = sst [smem:[#allocation14_spill]] %s1160_s5 }
   0x3   :  { %13 = vsyncpa [#allocation3], 0 }
   0x4   :  { %15 = vsyncpa [#allocation3 + $0x1], 0 }
   0x5   :  { %16 = vsyncpa [#allocation6], 0 }
   0x6   :  { %17 = vsyncpa [#allocation4], 0 }
   0x7   :  { %19 = vsyncpa [#allocation4 + $0x1], 0  ;;  %s974_s27 = smov 0   ;;  %s976_s28 = smov 0  }
   0x8   :  { %s978_s29 = smov 0   ;;  %s980_s30 = smov 0  }
   0x9 LB: > { %s1166_s3 = sld [smem:[#allocation13_spill]]  ;;  %s998_s12 = sadd.s32 4294967295, %s923_s30   ;;  %s923_s30 = sphi %s980_s30, %s1180_s30   ;;  %s919_s29 = sphi %s978_s29, %s1179_s29   ;;  %s915_s28 = sphi %s976_s28, %s1178_s28   ;;  %s911_s27 = sphi %s974_s27, %s1177_s27  }
   0xa   : > { %p665_p0 = scmp.ge.s32.totalorder %s923_s30, 1  ;;  %p98_p1 = scmp.eq.s32.totalorder %s998_s12, 0 }
   0xb   : > { %p239_p2 = scmp.lt.s32.totalorder %s923_s30, 3  ;;  %s925_s14 = smov [#allocation5]  }
   0xc   : > { %s252_s15 = sshll.u32 %s925_s14, 4  ;;  %s1168_s5 = sld [smem:[#allocation14_spill]]  ;;  %s253_s15 = int_to_ptr.vmem [resolvable:$true] %s252_s15 }
   0xd   : > { %p1003_p3 = pnand %p665_p0, %p239_p2  ;;  %s926_s19 = smov [#allocation7]  }
   0xe   : > { %s269_s20 = sshll.u32 %s926_s19, 4  ;;  %s927_s21 = smov 128   ;;  %s270_s20 = int_to_ptr.vmem [resolvable:$true] %s269_s20 }
   0xf   : > { %s250_s11 = sshll.u32 %s1166_s3, 4  ;;  %p704_p4 = pneg %p1003_p3  ;;  %s251_s11 = int_to_ptr.hbm [resolvable:$true] %s250_s11 }
  0x10   : > { %s928_s22 = smov 8   ;;  %s664_s23 = sadd.s32 4294967294, %s923_s30  }
  0x11   : > { %p705_p6 = pnand %p704_p4, %p98_p1  ;;  %s1017_s24 = sadd.s32 1, %s923_s30  }
  0x12   : > { %s267_s18 = sshll.u32 %s1168_s5, 4  ;;  %s81_s25 = ssub.s32 %s923_s30, %s1017_s24  ;;  %s268_s18 = int_to_ptr.hbm [resolvable:$true] %s267_s18 }
  0x13   : > { %707 = dma.hbm_to_vmem [thread:$0]  (!%p705_p6), %s251_s11, 512, %s253_s15, [#allocation6], %s927_s21, %s927_s21, %s928_s22  }
  0x14   : > { %710 = dma.hbm_to_vmem [thread:$0]  (!%p705_p6), %s268_s18, 512, %s270_s20, [#allocation6], %s927_s21, %s927_s21, %s928_s22  }
  0x15   : > { %s84_s26 = sadd.s32 1, %s919_s29  ;;  %p82_p7 = scmp.eq.s32.totalorder %s81_s25, 0 }
  0x16   : > { %p91_p8 = scmp.ne.s32.totalorder %s919_s29, %s915_s28  ;;  %p92_p9 = scmp.eq.s32.totalorder %s923_s30, 0 }
  0x17   : > { %p97_p10 = scmp.ne.s32.totalorder %s915_s28, %s911_s27  ;;  %p226_p13 = scmp.eq.s32.totalorder %s998_s12, 1 }
  0x18   : > { %s1028_s9 = scalar_select %p82_p7, %s919_s29, %s84_s26  }
  0x19   : > { %p1030_p11 = por %p92_p9, %p91_p8  ;;  %p1036_p12 = por %p98_p1, %p97_p10 }
  0x1a   : > { %1169 = sst [smem:[#allocation12_spill]] %s1028_s9  ;;  %p232_p0 = scmp.eq.s32.totalorder %s664_s23, 1 }
  0x1b   : > { %p721_p2 = scmp.lt.s32.totalorder %s923_s30, 2  ;;  %s304_s14 = sand.u32 1, %s919_s29  }
  0x1c   : > { %p1043_p4 = por %p226_p13, %p91_p8  ;;  %p1047_p6 = por %p232_p0, %p97_p10 }
  0x1d   : > { %s669_s17 = sshll.u32 %s304_s14, 3  ;;  %s670_s18 = sshll.u32 %s923_s30, 3 }
  0x1e   : > { %s312_s21 = scalar_lea.hbm %s1157_s2, %s670_s18  ;;  %s308_s22 = scalar_lea.vmem [#allocation2], %s669_s17 }
  0x1f   : > { %s316_s25 = sshll.u32 %s308_s22, 4  ;;  %s314_s26 = sshll.u32 %s312_s21, 4  ;;  %s317_s25 = int_to_ptr.vmem [resolvable:$true] %s316_s25  ;;  %s315_s26 = int_to_ptr.hbm [resolvable:$true] %s314_s26 }
  0x20   : > { %p1057_p7 = pnand %p721_p2, %p1030_p11  ;;  %s305_s3 = scalar_lea.sflag [#allocation3], %s304_s14 }
  0x21   : > { %s823_s5 = sshra.s32 %s315_s26, 4  ;;  %s830_s19 = scalar_lea.hbm %s1157_s2, 16  ;;  %s824_s5 = int_to_ptr.hbm [resolvable:$true] %s823_s5 }
  0x22   : > { %s825_s9 = scalar_lea.hbm %s824_s5, 8  ;;  %p827_p9 = pneg %p1057_p7 }
  0x23   : > { %p826_p8 = scmp.ne.s32.totalorder %s824_s5, %s825_s9  ;;  %p831_p11 = scmp.lt.s32.totalorder %s824_s5, %s1157_s2 }
  0x24   : > { %p832_p0 = scmp.lt.s32.totalorder %s830_s19, %s825_s9 }
  0x25   : > { %p828_p10 = pnand %p827_p9, %p826_p8 }
  0x26   : > { %p833_p2 = por %p832_p0, %p831_p11 }
  0x27   : > { %p829_p13 = pneg %p828_p10 }
  0x29   : > { %p834_p5 = pnand %p833_p2, %p829_p13 }
  0x2b   : > { %837 = shalt.err (!%p834_p5)
}
  0x2c   : > { %714 = dma.hbm_to_vmem [thread:$0]  (!%p1057_p7), %s315_s26, 128, %s317_s25, %s305_s3  }
  0x2d   : > { %325 = sbr.rel (%p1003_p3) target bundleno = 459 (0x1cb), region = 52  ;;  %s1074_s14 = sand.u32 (!%p1003_p3), 1, %s915_s28  }
  0x2e   : > { %s672_s21 = sshll.u32 (!%p1003_p3), %s1074_s14, 3  ;;  %s328_s22 = scalar_lea.sflag (!%p1003_p3), [#allocation3], %s1074_s14 }
  0x2f   : > { %s1080_s5 = scalar_lea.vmem (!%p1003_p3), [#allocation2], %s672_s21 }
  0x32   : > { %898 = dma.done.wait (%p1036_p12), %s328_s22, 128  }
  0x33   : > { %900 = vsyncadd (%p1036_p12), %s328_s22, 4294967168 }
  0x34   : > { %902 = dma.done.wait (%p98_p1), [#allocation6], 1024  }
  0x35   : > { %904 = vsyncadd (%p98_p1), [#allocation6], 4294966272  ;;  %p384_p3 = scmp.lt.s32.totalorder %s998_s12, 1  ;;  %v439_v0 = vld [vmem:[#allocation7 + $0x18] sm:$0xff]  ;;  %v438_v1 = vld [vmem:[#allocation7 + $0x10] sm:$0xff]  ;;  %vm477_vm0 = vcmask 1040384  }
  0x36   : > { %459 = vmatpush.msra.mxu1 %v439_v0  ;;  %v398_v2 = vld [vmem:[#allocation5 + $0x18] sm:$0xff]  ;;  %v437_v3 = vld [vmem:[#allocation7 + $0x8] sm:$0xff]  ;;  %v397_v4 = vld [vmem:[#allocation5 + $0x10] sm:$0xff]  ;;  %vm403_vm1 = vcmask 261120   ;;  %vm473_vm2 = vcmask 269312   ;;  %s688_s20 = sshll.u32 %s998_s12, 3 }
  0x37   : > { %s385_s3 = scalar_select %p384_p3, %s998_s12, 1  ;;  %422 = vmatpush.msra.mxu0 %v398_v2  ;;  %v396_v5 = vld [vmem:[#allocation5 + $0x8] sm:$0xff]  ;;  %v472_v6 = vld [vmem:[%s1162_s7 + $0x20] sm:$0x1]  ;;  %v436_v7 = vld [vmem:[#allocation7] sm:$0xff]  ;;  %vm533_vm4 = vcmask 80896  }
  0x38   : > { %460 = vmatpush.msra.mxu1 %v438_v1  ;;  %682 = vmatpush.msk.msra.mxu2 %vm477_vm0, %v472_v6  ;;  %v471_v8 = vld [vmem:[%s1162_s7 + $0x18] sm:$0xff]  ;;  %v395_v10 = vld [vmem:[#allocation5] sm:$0xff]  ;;  %v469_v14 = vld [vmem:[%s1162_s7 + $0x8] sm:$0xff]  ;;  %s536_s25 = scalar_lea.sflag [#allocation4], %s1074_s14 }
  0x39   : > { %s678_s13 = sshll.u32 %s385_s3, 3  ;;  %s691_s9 = sshll.u32 %s385_s3, 4  ;;  %423 = vmatpush.msra.mxu0 %v397_v4  ;;  %v470_v13 = vld [vmem:[%s1162_s7 + $0x10] sm:$0xff]  ;;  %v468_v15 = vld [vmem:[%s1162_s7] sm:$0xff] }
  0x3a   : > { %s392_s26 = scalar_lea.vmem %s1156_s1, %s678_s13  ;;  %s388_s18 = scalar_lea.vmem %s1155_s0, %s691_s9  ;;  %461 = vmatpush.msra.mxu1 %v437_v3  ;;  %493 = vmatpush.msra.mxu2 %v471_v8  ;;  %v761_v16 = vld [vmem:[%s1161_s6] ss:$0 sm:$0xff] }
  0x3b   : > { %v435_v9 = vld [vmem:[%s392_s26] sm:$0xff]  ;;  %424 = vmatpush.msra.mxu0 %v396_v5  ;;  %v394_v12 = vld [vmem:[%s388_s18 + $0x8] sm:$0x3]  ;;  %s546_s3 = scalar_lea.hbm %s1163_s8, %s688_s20  ;;  %s383_s13 = scalar_lea.vmem [#allocation8], %s672_s21 }
  0x3c   : > { %v393_v11 = vld [vmem:[%s388_s18] sm:$0xff]  ;;  %462 = vmatpush.msra.mxu1 %v436_v7  ;;  %494 = vmatpush.msra.mxu2 %v470_v13  ;;  %s548_s9 = sshll.u32 %s383_s13, 4  ;;  %s550_s11 = sshll.u32 %s546_s3, 4  ;;  %s549_s9 = int_to_ptr.vmem [resolvable:$true] %s548_s9  ;;  %s551_s11 = int_to_ptr.hbm [resolvable:$true] %s550_s11 }
  0x3d   : > { %681 = vmatmul.msk.f32.vlgmr.msra.gmra.mxu1 %vm403_vm1, %v435_v9  ;;  %425 = vmatpush.msra.mxu0 %v395_v10  ;;  %v762_v21 = vld [vmem:[%s1159_s4] ss:$0 sm:$0xff]  ;;  %s867_s26 = sshra.s32 %s551_s11, 4  ;;  %s873_s21 = scalar_lea.hbm %s1163_s8, 16  ;;  %s868_s26 = int_to_ptr.hbm [resolvable:$true] %s867_s26 }
  0x3e   : > { %679 = vmatmul.msk.f32.vlgmr.msra.gmra.mxu0 %vm403_vm1, %v393_v11  ;;  %495 = vmatpush.msra.mxu2 %v469_v14  ;;  %v530_v28 = vld [vmem:[%s1080_s5] sm:$0xff]  ;;  %s869_s12 = scalar_lea.hbm %s868_s26, 8  ;;  %p874_p7 = scmp.lt.s32.totalorder %s868_s26, %s1163_s8 }
  0x3f   : > { %vm531_vm3 = vcmp.eq.f32.partialorder %v530_v28, 0.0  ;;  %p870_p1 = scmp.ne.s32.totalorder %s868_s26, %s869_s12  ;;  %p875_p8 = scmp.lt.s32.totalorder %s873_s21, %s869_s12 }
  0x40   : > { %496 = vmatpush.msra.mxu2 %v468_v15 }
  0x41   : > { %p871_p5 = pnand %p870_p1, %p1043_p4  ;;  %p876_p9 = por %p875_p8, %p874_p7 }
  0x43   : > { %p872_p12 = pneg %p871_p5 }
  0x45   : > { %p877_p10 = pnand %p876_p9, %p872_p12 }
  0x46   : > { %680 = vmatmul.msk.f32.gmra.mxu0 %vm403_vm1, %v394_v12 }
  0xba   : > { %v464_v17 = vpop.f32.mrf.mxu1 }
  0xbb   : > { %v465_v18 = vadd.f32 %v761_v16, %v464_v17  ;;  %v427_v19 = vpop.f32.mrf.mxu0 }
  0xbc   : > { %v428_v23 = vadd.f32 %v762_v21, %v427_v19 }
  0xbd   : > { %v467_v20 = vmax.f32 %v465_v18, 0.0 }
  0xbe   : > { %v433_v26 = vmax.f32 %v428_v23, 0.0 }
  0xbf   : > { %683 = vmatmul.msk.f32.vlgmr.msra.gmra.mxu2 %vm473_vm2, %v467_v20 }
  0xc3   : > { %v430_v22 = vpop.f32.mrf.mxu0 }
  0xc4   : > { %v431_v24 = vadd.f32 %v762_v21, %v430_v22 }
  0xc6   : > { %v434_v25 = vmax.f32 %v431_v24, 0.0 }
  0xc8   : > { %684 = vmatpush.xpose.msk.msra.mxu3 %vm473_vm2, %v434_v25 }
  0xcc   : > { %685 = vmatpush.xpose.msk.msra.mxu3 %vm473_vm2, %v433_v26 }
 0x142   : > { %v498_v27 = vpop.f32.mrf.mxu2 }
 0x143   : > { %686 = vmatmul.msk.f32.vlgmr.msra.gmra.mxu3 %vm473_vm2, %v498_v27 }
 0x1c6   : > { %v527_v29 = vpop.f32.mrf.mxu3 }
 0x1c7   : > { %v532_v30 = vsel %vm531_vm3, -1e+08, %v527_v29 }
 0x1c8   : > { %534 = vst.msk [vmem:[%s383_s13] sm:$0xff] %vm533_vm4, %v532_v30 }
 0x1c9   : > { %880 = shalt.err (!%p877_p10)
}
 0x1ca   : > { %702 = dma.vmem_to_hbm [thread:$0]  (%p1043_p4), %s549_s9, 128, %s551_s11, %s536_s25  }
 0x1cb PF: > { %s562_s14 = sand.u32 1, %s911_s27   ;;  %p1175_p13 = scmp.ge.s32.totalorder %s923_s30, 2 }
 0x1cc   : > { %s563_s19 = scalar_lea.sflag [#allocation4], %s562_s14 }
 0x1cd   : > { %p716_p11 = pnand %p1175_p13, %p1047_p6 }
 0x1cf   : > { %p717_p0 = pneg %p716_p11 }
 0x1d1   : > { %906 = dma.done.wait (%p717_p0), %s563_s19, 128  }
 0x1d2   : > { %908 = vsyncadd (%p717_p0), %s563_s19, 4294967168  ;;  %s1176_s20 = sld [smem:[#allocation12_spill]]  ;;  %p22_p2 = scmp.ge.s32.totalorder %s1017_s24, 4  }
 0x1d3   : > { %s1177_s27 = smov %s915_s28  ;;  %s1178_s28 = smov %s919_s29 }
 0x1d4   : > { %s1180_s30 = smov %s1017_s24  ;;  %24 = sbr.rel (!%p22_p2) target bundleno = 9 (0x9), region = 111 }
 0x1d8   : > { %s1179_s29 = smov %s1176_s20 }
 0x1d9   :  { %569 = vsyncpa [#allocation3], 1 }
 0x1da   :  { %571 = vsyncpa [#allocation3 + $0x1], 1 }
 0x1db   :  { %572 = vsyncpa [#allocation6], 1 }
 0x1dc   :  { %573 = vsyncpa [#allocation4], 1 }
 0x1dd   :  { %575 = vsyncpa [#allocation4 + $0x1], 1 }

</bundles_post_ra>
